<compile_context>
chip_gen: v6e
topology: v6e:2x2x1
jax: 0.10.0
libtpu: 0.0.40
codegen_flags: <defaults>
</compile_context>

<pallas_src>
import numpy as np
import jax
import jax.numpy as jnp
from jax.experimental import pallas as pl
from jax.experimental.pallas import tpu as pltpu

KERNEL_SIZE = 25  # fixed in the PyTorch Model


def _round_up(x: int, m: int) -> int:
    return ((x + m - 1) // m) * m


def _build_moving_avg_matrix(seq_len: int, kernel_size: int) -> jnp.ndarray:
    """M[t, s] such that (M @ x)[t] == mean over the replicate-padded window."""
    pad = (kernel_size - 1) // 2
    t = np.arange(seq_len)[:, None]                  # (L, 1)
    k = np.arange(kernel_size)[None, :] - pad        # (1, K)
    src = np.clip(t + k, 0, seq_len - 1)             # (L, K)
    M = np.zeros((seq_len, seq_len), dtype=np.float32)
    rows = np.repeat(np.arange(seq_len), kernel_size)
    np.add.at(M, (rows, src.reshape(-1)), 1.0 / kernel_size)
    return jnp.asarray(M)


def _choose_lane_tile(n_lanes: int, l: int, p: int, in_bytes: int, out_bytes: int,
                      budget_bytes: int = 20 << 20, tn_max: int = 2048) -> int:
    """Largest multiple-of-128 lane tile whose double-buffered in+out streams
    fit the VMEM budget (works for v5e/v6e 128 MiB and v7x 64 MiB parts)."""
    if n_lanes < 128:
        return n_lanes                       # single full-extent block, exact dims
    per_lane = 2 * (l * in_bytes + p * out_bytes)      # 2x double-buffered
    tn = (budget_bytes // per_lane) // 128 * 128
    tn = max(128, min(int(tn), tn_max))
    return min(tn, _round_up(n_lanes, 128))


def _dssrnn_kernel(w_ref, b_ref, x_ref, o_ref):
    # w_ref: (P, L) fused weight; b_ref: (P, 1) f32 fused bias;
    # x_ref: (L, tn) lane slab; o_ref: (P, tn).
    # Single MXU matmul, f32 accumulation, lane-dense store.
    acc = jnp.dot(w_ref[...], x_ref[...], preferred_element_type=jnp.float32)
    o_ref[...] = (acc + b_ref[...]).astype(o_ref.dtype)


def dssrnn_forward(x, M, w_seasonal, b_seasonal, w_trend, b_trend, pred_len,
                   compute_dtype=jnp.bfloat16, lane_tile=None):
    B, L, C = x.shape
    P = pred_len
    out_dtype = x.dtype

    # ---- parameter-only precompute (outside the kernel, runs once) ----
    eye = jnp.eye(L, dtype=jnp.float32)
    w_eff = (w_seasonal.astype(jnp.float32) @ (eye - M)
             + w_trend.astype(jnp.float32) @ M).astype(compute_dtype)    # (P, L)
    b_eff = (b_seasonal + b_trend).reshape(P, 1).astype(jnp.float32)     # (P, 1)

    xc = x.astype(compute_dtype)

    in_bytes = int(np.dtype(compute_dtype).itemsize)
    out_bytes = int(np.dtype(out_dtype).itemsize)

    cost = pl.CostEstimate(
        flops=2 * P * L * B * C,
        transcendentals=0,
        bytes_accessed=(L * B * C) * in_bytes + (P * B * C) * out_bytes
                       + P * L * in_bytes + P * 4,
    )
    vmem_limit = 40 << 20   # comfortably under v7x's 64 MiB physical VMEM

    if C >= 128:
        # ---- natural-layout path: no wrapper transposes, output lands (B,P,C) ----
        tc = lane_tile or _choose_lane_tile(C, L, P, in_bytes, out_bytes)
        grid = (B, pl.cdiv(C, tc))
        return pl.pallas_call(
            _dssrnn_kernel,
            out_shape=jax.ShapeDtypeStruct((B, P, C), out_dtype),
            grid_spec=pltpu.PrefetchScalarGridSpec(
                num_scalar_prefetch=0,
                grid=grid,
                in_specs=[
                    pl.BlockSpec((P, L), lambda b, c: (0, 0)),        # fused weight (invariant)
                    pl.BlockSpec((P, 1), lambda b, c: (0, 0)),        # fused bias   (invariant)
                    pl.BlockSpec((None, L, tc), lambda b, c: (b, 0, c)),   # (L, tc) slab
                ],
                out_specs=pl.BlockSpec((None, P, tc), lambda b, c: (b, 0, c)),
            ),
            compiler_params=pltpu.CompilerParams(
                dimension_semantics=("parallel", "parallel"),
                vmem_limit_bytes=vmem_limit),
            cost_estimate=cost,
        )(w_eff, b_eff, xc)

    # ---- small-C path: flatten batch*channels into one lane-dense dimension ----
    N = B * C
    x2 = jnp.transpose(xc, (1, 0, 2)).reshape(L, N)                      # (L, N)
    tn = lane_tile or _choose_lane_tile(N, L, P, in_bytes, out_bytes)
    grid = (pl.cdiv(N, tn),)       # ragged last tile handled by masked store

    out2 = pl.pallas_call(
        _dssrnn_kernel,
        out_shape=jax.ShapeDtypeStruct((P, N), out_dtype),
        grid_spec=pltpu.PrefetchScalarGridSpec(
            num_scalar_prefetch=0,
            grid=grid,
            in_specs=[
                pl.BlockSpec((P, L), lambda n: (0, 0)),    # fused weight (invariant)
                pl.BlockSpec((P, 1), lambda n: (0, 0)),    # fused bias   (invariant)
                pl.BlockSpec((L, tn), lambda n: (0, n)),   # input lane slab
            ],
            out_specs=pl.BlockSpec((P, tn), lambda n: (0, n)),
        ),
        compiler_params=pltpu.CompilerParams(
            dimension_semantics=("parallel",),
            vmem_limit_bytes=vmem_limit),
        cost_estimate=cost,
    )(w_eff, b_eff, x2)

    return jnp.transpose(out2.reshape(P, B, C), (1, 0, 2))               # (B, P, C)


def dssrnn_reference(x, M, w_seasonal, b_seasonal, w_trend, b_trend):
    # Pure-JAX reference mirroring the PyTorch forward (same simplifications,
    # unfused: decomposition + two separate heads), all in f32.
    trend = jnp.einsum("ts,bsc->btc", M, x)
    seasonal = x - trend
    trend_perm = jnp.transpose(trend, (0, 2, 1))        # (B, C, L)
    seas_perm = jnp.transpose(seasonal, (0, 2, 1))      # (B, C, L)
    trend_out = trend_perm @ w_trend.T + b_trend        # (B, C, P)
    seas_out = seas_perm @ w_seasonal.T + b_seasonal    # (B, C, P)
    return jnp.transpose(seas_out + trend_out, (0, 2, 1))  # (B, P, C)


if __name__ == "__main__":
    def run_case(B, L, C, P, key, compute_dtype, rtol, atol, lane_tile=None):
        kx, kws, kbs, kwt, kbt = jax.random.split(key, 5)
        x = jax.random.normal(kx, (B, L, C), dtype=jnp.float32)
        bound = 1.0 / np.sqrt(L)
        w_seasonal = jax.random.uniform(kws, (P, L), jnp.float32, -bound, bound)
        b_seasonal = jax.random.uniform(kbs, (P,), jnp.float32, -bound, bound)
        w_trend = jax.random.uniform(kwt, (P, L), jnp.float32, -bound, bound)
        b_trend = jax.random.uniform(kbt, (P,), jnp.float32, -bound, bound)
        M = _build_moving_avg_matrix(L, KERNEL_SIZE)

        out = dssrnn_forward(x, M, w_seasonal, b_seasonal, w_trend, b_trend, P,
                             compute_dtype=compute_dtype, lane_tile=lane_tile)
        out = jax.block_until_ready(out)

        ref = dssrnn_reference(x, M, w_seasonal, b_seasonal, w_trend, b_trend)
        assert out.shape == (B, P, C)
        np.testing.assert_allclose(np.asarray(out, dtype=np.float32),
                                   np.asarray(ref), rtol=rtol, atol=atol)

    key = jax.random.PRNGKey(0)
    k1, k2, k3 = jax.random.split(key, 3)

    # 1) small-C flatten path, exact f32 data movement (tight tolerance)
    run_case(2, 32, 4, 8, k1, jnp.float32, 1e-4, 1e-5)
    # 2) small-C flatten path, bf16 data movement / f32 accumulate
    run_case(2, 32, 4, 8, k1, jnp.bfloat16, 3e-2, 3e-2)
    # 3) lane-friendly C: natural (B, L, C) layout path, no wrapper transposes
    run_case(2, 48, 128, 16, k2, jnp.float32, 1e-4, 1e-5)
    run_case(2, 48, 128, 16, k2, jnp.bfloat16, 3e-2, 3e-2)
    # 4) ragged last lane tile (masked-store path), forced 128-lane tile
    run_case(3, 32, 60, 8, k3, jnp.float32, 1e-4, 1e-5, lane_tile=128)

    print("KERNEL_OK")
</pallas_src>

<mosaic_0001>
module attributes {stable_mosaic.version = 11 : i64} {
  func.func @_dssrnn_kernel(%arg0: i32, %arg1: memref<8x32xf32, #tpu.memory_space<vmem>>, %arg2: memref<8x1xf32, #tpu.memory_space<vmem>>, %arg3: memref<32x8xf32, #tpu.memory_space<vmem>>, %arg4: memref<8x8xf32, #tpu.memory_space<vmem>>) attributes {dimension_semantics = [#tpu.dimension_semantics<parallel>], iteration_bounds = array<i64: 1>, scalar_prefetch = 0 : i64, scratch_operands = 0 : i64, tpu.core_type = #tpu.core_type<tc>, window_params = [{pipeline_mode = #tpu.pipeline_mode<synchronous>, transform_indices = @transform_0, window_bounds = array<i64: 8, 32>}, {pipeline_mode = #tpu.pipeline_mode<synchronous>, transform_indices = @transform_1, window_bounds = array<i64: 8, 1>}, {transform_indices = @transform_2, window_bounds = array<i64: 32, 8>}, {transform_indices = @transform_3, window_bounds = array<i64: 8, 8>}]} {
    %c0 = arith.constant 0 : index
    %c0_0 = arith.constant 0 : index
    %0 = vector.load %arg1[%c0, %c0_0] : memref<8x32xf32, #tpu.memory_space<vmem>>, vector<8x32xf32>
    %c0_1 = arith.constant 0 : index
    %c0_2 = arith.constant 0 : index
    %1 = vector.load %arg3[%c0_1, %c0_2] : memref<32x8xf32, #tpu.memory_space<vmem>>, vector<32x8xf32>
    %cst = arith.constant dense<0.000000e+00> : vector<8x8xf32>
    %2 = tpu.matmul %0, %1, %cst {dimension_numbers = #tpu.dot_dimension_numbers<[1], [0], [0], [1], [0, 0, 1, 1], [], []>} : vector<8x32xf32>, vector<32x8xf32>, vector<8x8xf32> -> vector<8x8xf32>
    %c0_3 = arith.constant 0 : index
    %c0_4 = arith.constant 0 : index
    %3 = vector.load %arg2[%c0_3, %c0_4] : memref<8x1xf32, #tpu.memory_space<vmem>>, vector<8x1xf32>
    %4 = vector.broadcast %3 : vector<8x1xf32> to vector<8x8xf32>
    %5 = arith.addf %2, %4 : vector<8x8xf32>
    %c0_5 = arith.constant 0 : index
    %c0_6 = arith.constant 0 : index
    %6 = vector.load %arg4[%c0_5, %c0_6] : memref<8x8xf32, #tpu.memory_space<vmem>>, vector<8x8xf32>
    tpu.vector_store %arg4[%c0_5, %c0_6], %5 {strides = array<i32>} : memref<8x8xf32, #tpu.memory_space<vmem>>, vector<8x8xf32>,
    return
  }
  func.func @transform_0(%arg0: i32) -> (i32, i32) {
    %c0_i32 = arith.constant 0 : i32
    %c0_i32_0 = arith.constant 0 : i32
    %c0_i32_1 = arith.constant 0 : i32
    return %c0_i32, %c0_i32_0 : i32, i32
  }
  func.func @transform_1(%arg0: i32) -> (i32, i32) {
    %c0_i32 = arith.constant 0 : i32
    %c0_i32_0 = arith.constant 0 : i32
    %c0_i32_1 = arith.constant 0 : i32
    return %c0_i32, %c0_i32_0 : i32, i32
  }
  func.func @transform_2(%arg0: i32) -> (i32, i32) {
    %c0_i32 = arith.constant 0 : i32
    %c0_i32_0 = arith.constant 0 : i32
    return %c0_i32, %arg0 : i32, i32
  }
  func.func @transform_3(%arg0: i32) -> (i32, i32) {
    %c0_i32 = arith.constant 0 : i32
    %c0_i32_0 = arith.constant 0 : i32
    return %c0_i32, %arg0 : i32, i32
  }
}

</mosaic_0001>

<bundles_post_ra>
// kernel: tpu_custom_call.1
= control target key start
LH: loop header
LB: loop body
LE: loop exit
PB: predicated region body
PF: predicated region fallthrough
CT: control target
= control target key end

     0   :  { %v160_v1 = vmov 0.0   ;;  %vm161_vm0 = vmmov 0   ;;  %v162_v4 = vmov 0   ;;  %s205_s0 = inlined_call_operand.vmem [shape: f32[8,32], index: 0, kind: input, shape index: {}]   ;;  %s206_s1 = inlined_call_operand.vmem [shape: f32[8,1], index: 1, kind: input, shape index: {}]   ;;  %s207_s2 = inlined_call_operand.vmem [shape: f32[32,8], index: 2, kind: input, shape index: {}]   ;;  %s208_s3 = inlined_call_operand.hbm [shape: f32[8,8], index: 3, kind: output, shape index: {}]  }
   0x1   :  { %v19_v0 = vld [vmem:[%s207_s2 + $0x18] sm:$0xff]  ;;  %122 = vmatprep.subr.mxu0 %v160_v1  ;;  %v18_v2 = vld [vmem:[%s207_s2 + $0x10] sm:$0xff]  ;;  %130 = vmatprep.mubr.msk.f32.mxu0 %vm161_vm0, %v160_v1  ;;  %v20_v3 = vld [vmem:[%s206_s1] sm:$0xff] }
   0x2   :  { %123 = vmatpush3.msra.mxu0 %v19_v0  ;;  %137 = vset.pattern.permute.xlu0 %v162_v4 }
   0x3   :  { %8 = vsyncpa [#allocation3], 0  ;;  %124 = vmatprep.subr.mxu0 %v160_v1  ;;  %v17_v5 = vld [vmem:[%s207_s2 + $0x8] sm:$0xff]  ;;  %23 = vperm.xlu0 %137, %v20_v3   ;;  %v16_v6 = vld [vmem:[%s207_s2] sm:$0xff]  ;;  %vm26_vm1 = vcmask 261120   ;;  %s163_s1 = smov [#allocation2]  }
   0x4   :  { %125 = vmatpush3.msra.mxu0 %v18_v2  ;;  %v15_v7 = vld [vmem:[%s205_s0] sm:$0xff]  ;;  %s108_s24 = sshll.u32 %s163_s1, 4  ;;  %vm100_vm2 = vcmask 64512   ;;  %s109_s24 = int_to_ptr.vmem [resolvable:$true] %s108_s24 }
   0x5   :  { %126 = vmatprep.subr.mxu0 %v160_v1  ;;  %s138_s25 = scalar_lea.vmem %s109_s24, 128  ;;  %p143_p1 = scmp.lt.s32.totalorder %s109_s24, %s109_s24 }
   0x6   :  { %127 = vmatpush3.msra.mxu0 %v17_v5  ;;  %p139_p0 = scmp.ne.s32.totalorder %s109_s24, %s138_s25  ;;  %p144_p2 = scmp.lt.s32.totalorder %s138_s25, %s138_s25 }
   0x7   :  { %128 = vmatprep.subr.mxu0 %v160_v1 }
   0x8   :  { %129 = vmatpush3.msra.mxu0 %v16_v6  ;;  %p145_p3 = por %p144_p2, %p143_p1 }
   0x9   :  { %131 = vmatmul.mubr.msk.f32.vlgmr.msra.gmra.mxu0 %vm26_vm1, %v15_v7 }
   0xa   :  { %p146_p4 = pnand %p145_p3, %p139_p0 }
  0x7e   :  { %v24_v8 = vpop.permute.xlu0 %23 }
  0xc9   :  { %v96_v9 = vpop.f32.mrf.mxu0 }
  0xca   :  { %v97_v10 = vadd.f32 %v96_v9, %v24_v8 }
  0xcb   :  { %v132_v11 = vpop.f32.mrf.mxu0 }
  0xcc   :  { %101 = vst.msk [vmem:[#allocation2] sm:$0xff] %vm100_vm2, %v97_v10 }
  0xcd   :  { %149 = shalt.err (!%p146_p4)
}
  0xce   :  { %111 = dma.vmem_to_hbm [thread:$0]  %s109_s24, 128, %s208_s3, [#allocation3]  }
  0xcf   :  { %158 = dma.done.wait [#allocation3], 128  }
  0xd0   :  { %159 = vsyncadd [#allocation3], 4294967168 }
  0xd1   :  { %115 = vsyncpa [#allocation3], 1 }

</bundles_post_ra>
